<compile_context>
chip_gen: v7x
topology: tpu7x:2x2x1
jax: 0.10.0
libtpu: 0.0.40
codegen_flags: <defaults>
</compile_context>

<pallas_src>
import functools

import jax
import jax.numpy as jnp
from jax.experimental import pallas as pl
from jax.experimental.pallas import tpu as pltpu

LANE = 128


def _round_up(x, m):
    return ((x + m - 1) // m) * m


def r_to_musigma_kernel(r_ref, wh_ref, bh_ref, wheads_ref, bheads_ref,
                        out_ref, *, z_dim):
    # r_ref:      [tm, r_dim]      f32   (one batch-row tile)
    # wh_ref:     [r_dim, r_dim]   bf16, bh_ref:     [1, r_dim]    f32
    # wheads_ref: [r_dim, head_pad] bf16, bheads_ref: [1, head_pad] f32
    #   lanes [0, z_dim)        -> mu head
    #   lanes [z_dim, 2*z_dim)  -> sigma head
    # out_ref:    [tm, head_pad]  f32  (lane-dense, head_pad % 128 == 0)

    # h = relu(r @ Wh + bh)   -- bf16 MXU operands, f32 accumulation
    r = r_ref[...].astype(jnp.bfloat16)
    h = jnp.dot(r, wh_ref[...], preferred_element_type=jnp.float32) + bh_ref[...]
    h = jnp.maximum(h, 0.0).astype(jnp.bfloat16)

    # Single packed-head matmul: y holds both mu and sigma pre-activations.
    y = jnp.dot(h, wheads_ref[...], preferred_element_type=jnp.float32) + bheads_ref[...]

    # sigma lanes get 0.1 + 0.9 * sigmoid(y); mu lanes pass through.
    # sigmoid(x) = 0.5 * (tanh(0.5 x) + 1)  -> one EUP tanh per vreg.
    sig = 0.1 + 0.9 * (0.5 * (jnp.tanh(0.5 * y) + 1.0))
    lane = jax.lax.broadcasted_iota(jnp.int32, y.shape, 1)
    out = jnp.where(lane >= z_dim, sig, y)
    out_ref[...] = out.astype(out_ref.dtype)


def prepare_params(raw):
    """One-time parameter prep (NOT per call): transpose to [in, out], pack the
    mu/sigma heads into a single lane-dense weight, cast MXU weights to bf16."""
    r_dim = raw["w_h"].shape[0]
    z_dim = raw["w_mu"].shape[0]
    head_pad = max(LANE, _round_up(2 * z_dim, LANE))

    w_heads = jnp.zeros((r_dim, head_pad), jnp.float32)
    w_heads = w_heads.at[:, :z_dim].set(raw["w_mu"].T)
    w_heads = w_heads.at[:, z_dim:2 * z_dim].set(raw["w_sigma"].T)

    b_heads = jnp.zeros((1, head_pad), jnp.float32)
    b_heads = b_heads.at[:, :z_dim].set(raw["b_mu"].reshape(1, -1))
    b_heads = b_heads.at[:, z_dim:2 * z_dim].set(raw["b_sigma"].reshape(1, -1))

    return {
        "w_h": raw["w_h"].T.astype(jnp.bfloat16),                 # [r_dim, r_dim]
        "b_h": raw["b_h"].reshape(1, r_dim).astype(jnp.float32),  # [1, r_dim]
        "w_heads": w_heads.astype(jnp.bfloat16),                  # [r_dim, head_pad]
        "b_heads": b_heads,                                       # [1, head_pad]
        "head_pad": head_pad,
        "z_dim": z_dim,
    }


def _choose_tiling(B, tm):
    """Pick a row-tile size: large tiles (few grid steps) but an even step count
    so both v7x TensorCores get work; tm capped at 1024 keeps per-step VMEM
    ~1.5 MiB (safe under v5e 16 MiB scoped / v7x 32 MiB scoped defaults)."""
    if tm is None:
        tm = min(1024, _round_up(pl.cdiv(B, 2), 8))
    n_blocks = max(2, pl.cdiv(B, tm))
    if n_blocks % 2:
        n_blocks += 1
    tm = _round_up(pl.cdiv(B, n_blocks), 8)
    return tm, n_blocks, n_blocks * tm


def r_to_musigma(r, prep, *, tm=None):
    """r: [B, r_dim] f32 -> (mu [B, z_dim], sigma [B, z_dim])."""
    B, r_dim = r.shape
    z_dim = prep["z_dim"]
    head_pad = prep["head_pad"]

    tm, n_blocks, Bp = _choose_tiling(B, tm)
    if Bp != B:
        r = jnp.pad(r, ((0, Bp - B), (0, 0)))

    row_in = pl.BlockSpec((tm, r_dim), lambda i: (i, 0))
    row_out = pl.BlockSpec((tm, head_pad), lambda i: (i, 0))

    def resident(arr):
        # Constant index_map -> fetched once, stays VMEM-resident across steps.
        return pl.BlockSpec(arr.shape, lambda i: (0, 0))

    out = pl.pallas_call(
        functools.partial(r_to_musigma_kernel, z_dim=z_dim),
        grid=(n_blocks,),
        in_specs=[row_in,
                  resident(prep["w_h"]), resident(prep["b_h"]),
                  resident(prep["w_heads"]), resident(prep["b_heads"])],
        out_specs=row_out,
        out_shape=jax.ShapeDtypeStruct((Bp, head_pad), jnp.float32),
        compiler_params=pltpu.CompilerParams(
            dimension_semantics=("parallel",)),
    )(r, prep["w_h"], prep["b_h"], prep["w_heads"], prep["b_heads"])

    mu = out[:B, :z_dim]
    sigma = out[:B, z_dim:2 * z_dim]
    return mu, sigma


def reference(r, raw):
    """Pure-JAX f32 reference mirroring the PyTorch forward."""
    h = jnp.maximum(r @ raw["w_h"].T + raw["b_h"], 0.0)
    mu = h @ raw["w_mu"].T + raw["b_mu"]
    sigma = 0.1 + 0.9 * jax.nn.sigmoid(h @ raw["w_sigma"].T + raw["b_sigma"])
    return mu, sigma


if __name__ == "__main__":
    # Small shapes consistent with the module: batch of B contexts,
    # representation dim r_dim, latent dim z_dim.
    B, r_dim, z_dim = 256, 64, 16

    key = jax.random.PRNGKey(0)
    ks = jax.random.split(key, 7)

    r = jax.random.normal(ks[0], (B, r_dim), dtype=jnp.float32)

    # nn.Linear-style parameters in PyTorch layout: W is [out, in], b is [out].
    raw = {
        "w_h": jax.random.normal(ks[1], (r_dim, r_dim), dtype=jnp.float32) / jnp.sqrt(r_dim),
        "b_h": jax.random.normal(ks[2], (r_dim,), dtype=jnp.float32) * 0.01,
        "w_mu": jax.random.normal(ks[3], (z_dim, r_dim), dtype=jnp.float32) / jnp.sqrt(r_dim),
        "b_mu": jax.random.normal(ks[4], (z_dim,), dtype=jnp.float32) * 0.01,
        "w_sigma": jax.random.normal(ks[5], (z_dim, r_dim), dtype=jnp.float32) / jnp.sqrt(r_dim),
        "b_sigma": jax.random.normal(ks[6], (z_dim,), dtype=jnp.float32) * 0.01,
    }

    prep = prepare_params(raw)

    mu, sigma = r_to_musigma(r, prep)
    jax.block_until_ready((mu, sigma))

    mu_ref, sigma_ref = reference(r, raw)
    assert mu.shape == (B, z_dim) and sigma.shape == (B, z_dim)

    err_mu = float(jnp.max(jnp.abs(mu - mu_ref)))
    err_sig = float(jnp.max(jnp.abs(sigma - sigma_ref)))
    # Tolerance accounts for bf16 MXU operands vs the exact-f32 reference.
    assert err_mu < 5e-2, f"mu mismatch vs reference: {err_mu}"
    assert err_sig < 5e-2, f"sigma mismatch vs reference: {err_sig}"

    print("KERNEL_OK")
</pallas_src>

<mosaic_0001>
module attributes {stable_mosaic.version = 11 : i64} {
  func.func @r_to_musigma_kernel(%arg0: i32, %arg1: memref<128x64xf32, #tpu.memory_space<vmem>>, %arg2: memref<64x64xbf16, #tpu.memory_space<vmem>>, %arg3: memref<1x64xf32, #tpu.memory_space<vmem>>, %arg4: memref<64x128xbf16, #tpu.memory_space<vmem>>, %arg5: memref<1x128xf32, #tpu.memory_space<vmem>>, %arg6: memref<128x128xf32, #tpu.memory_space<vmem>>) attributes {dimension_semantics = [#tpu.dimension_semantics<parallel>], iteration_bounds = array<i64: 2>, scalar_prefetch = 0 : i64, scratch_operands = 0 : i64, tpu.core_type = #tpu.core_type<tc>, window_params = [{transform_indices = @transform_0, window_bounds = array<i64: 128, 64>}, {pipeline_mode = #tpu.pipeline_mode<synchronous>, transform_indices = @transform_1, window_bounds = array<i64: 64, 64>}, {pipeline_mode = #tpu.pipeline_mode<synchronous>, transform_indices = @transform_2, window_bounds = array<i64: 1, 64>}, {pipeline_mode = #tpu.pipeline_mode<synchronous>, transform_indices = @transform_3, window_bounds = array<i64: 64, 128>}, {pipeline_mode = #tpu.pipeline_mode<synchronous>, transform_indices = @transform_4, window_bounds = array<i64: 1, 128>}, {transform_indices = @transform_5, window_bounds = array<i64: 128, 128>}]} {
    %c0 = arith.constant 0 : index
    %c0_0 = arith.constant 0 : index
    %0 = vector.load %arg1[%c0, %c0_0] : memref<128x64xf32, #tpu.memory_space<vmem>>, vector<128x64xf32>
    %1 = arith.truncf %0 : vector<128x64xf32> to vector<128x64xbf16>
    %c0_1 = arith.constant 0 : index
    %c0_2 = arith.constant 0 : index
    %2 = vector.load %arg2[%c0_1, %c0_2] : memref<64x64xbf16, #tpu.memory_space<vmem>>, vector<64x64xbf16>
    %cst = arith.constant dense<0.000000e+00> : vector<128x64xf32>
    %3 = tpu.matmul %1, %2, %cst {dimension_numbers = #tpu.dot_dimension_numbers<[1], [0], [0], [1], [0, 0, 1, 1], [], []>} : vector<128x64xbf16>, vector<64x64xbf16>, vector<128x64xf32> -> vector<128x64xf32>
    %c0_3 = arith.constant 0 : index
    %c0_4 = arith.constant 0 : index
    %4 = vector.load %arg3[%c0_3, %c0_4] : memref<1x64xf32, #tpu.memory_space<vmem>>, vector<1x64xf32>
    %5 = vector.broadcast %4 : vector<1x64xf32> to vector<128x64xf32>
    %6 = arith.addf %3, %5 : vector<128x64xf32>
    %cst_5 = arith.constant 0.000000e+00 : f32
    %7 = vector.broadcast %cst_5 : f32 to vector<128x64xf32>
    %8 = arith.maximumf %6, %7 : vector<128x64xf32>
    %9 = arith.truncf %8 : vector<128x64xf32> to vector<128x64xbf16>
    %c0_6 = arith.constant 0 : index
    %c0_7 = arith.constant 0 : index
    %10 = vector.load %arg4[%c0_6, %c0_7] : memref<64x128xbf16, #tpu.memory_space<vmem>>, vector<64x128xbf16>
    %cst_8 = arith.constant dense<0.000000e+00> : vector<128x128xf32>
    %11 = tpu.matmul %9, %10, %cst_8 {dimension_numbers = #tpu.dot_dimension_numbers<[1], [0], [0], [1], [0, 0, 1, 1], [], []>} : vector<128x64xbf16>, vector<64x128xbf16>, vector<128x128xf32> -> vector<128x128xf32>
    %c0_9 = arith.constant 0 : index
    %c0_10 = arith.constant 0 : index
    %12 = vector.load %arg5[%c0_9, %c0_10] : memref<1x128xf32, #tpu.memory_space<vmem>>, vector<1x128xf32>
    %13 = vector.broadcast %12 : vector<1x128xf32> to vector<128x128xf32>
    %14 = arith.addf %11, %13 : vector<128x128xf32>
    %cst_11 = arith.constant 5.000000e-01 : f32
    %15 = vector.broadcast %cst_11 : f32 to vector<128x128xf32>
    %16 = arith.mulf %15, %14 : vector<128x128xf32>
    %17 = math.tanh %16 : vector<128x128xf32>
    %cst_12 = arith.constant 1.000000e+00 : f32
    %18 = vector.broadcast %cst_12 : f32 to vector<128x128xf32>
    %19 = arith.addf %17, %18 : vector<128x128xf32>
    %cst_13 = arith.constant 5.000000e-01 : f32
    %20 = vector.broadcast %cst_13 : f32 to vector<128x128xf32>
    %21 = arith.mulf %20, %19 : vector<128x128xf32>
    %cst_14 = arith.constant 0.899999976 : f32
    %22 = vector.broadcast %cst_14 : f32 to vector<128x128xf32>
    %23 = arith.mulf %22, %21 : vector<128x128xf32>
    %cst_15 = arith.constant 1.000000e-01 : f32
    %24 = vector.broadcast %cst_15 : f32 to vector<128x128xf32>
    %25 = arith.addf %24, %23 : vector<128x128xf32>
    %26 = tpu.iota {dimensions = array<i32: 1>} : vector<128x128xi32>
    %c16_i32 = arith.constant 16 : i32
    %27 = vector.broadcast %c16_i32 : i32 to vector<128x128xi32>
    %28 = arith.cmpi sge, %26, %27 : vector<128x128xi32>
    %29 = arith.select %28, %25, %14 : vector<128x128xi1>, vector<128x128xf32>
    %c0_16 = arith.constant 0 : index
    %c0_17 = arith.constant 0 : index
    %30 = vector.load %arg6[%c0_16, %c0_17] : memref<128x128xf32, #tpu.memory_space<vmem>>, vector<128x128xf32>
    tpu.vector_store %arg6[%c0_16, %c0_17], %29 {strides = array<i32>} : memref<128x128xf32, #tpu.memory_space<vmem>>, vector<128x128xf32>,
    return
  }
  func.func @transform_0(%arg0: i32) -> (i32, i32) {
    %c0_i32 = arith.constant 0 : i32
    %c0_i32_0 = arith.constant 0 : i32
    return %arg0, %c0_i32 : i32, i32
  }
  func.func @transform_1(%arg0: i32) -> (i32, i32) {
    %c0_i32 = arith.constant 0 : i32
    %c0_i32_0 = arith.constant 0 : i32
    %c0_i32_1 = arith.constant 0 : i32
    return %c0_i32, %c0_i32_0 : i32, i32
  }
  func.func @transform_2(%arg0: i32) -> (i32, i32) {
    %c0_i32 = arith.constant 0 : i32
    %c0_i32_0 = arith.constant 0 : i32
    %c0_i32_1 = arith.constant 0 : i32
    return %c0_i32, %c0_i32_0 : i32, i32
  }
  func.func @transform_3(%arg0: i32) -> (i32, i32) {
    %c0_i32 = arith.constant 0 : i32
    %c0_i32_0 = arith.constant 0 : i32
    %c0_i32_1 = arith.constant 0 : i32
    return %c0_i32, %c0_i32_0 : i32, i32
  }
  func.func @transform_4(%arg0: i32) -> (i32, i32) {
    %c0_i32 = arith.constant 0 : i32
    %c0_i32_0 = arith.constant 0 : i32
    %c0_i32_1 = arith.constant 0 : i32
    return %c0_i32, %c0_i32_0 : i32, i32
  }
  func.func @transform_5(%arg0: i32) -> (i32, i32) {
    %c0_i32 = arith.constant 0 : i32
    %c0_i32_0 = arith.constant 0 : i32
    return %arg0, %c0_i32 : i32, i32
  }
}

</mosaic_0001>

<bundles_post_ra>
// kernel: tpu_custom_call.1
= control target key start
LH: loop header
LB: loop body
LE: loop exit
PB: predicated region body
PF: predicated region fallthrough
CT: control target
= control target key end

     0   :  { %10 = vsyncpa [#allocation3], 0  ;;  %s1398_s0 = inlined_call_operand.vmem [shape: f32[256,64], index: 0, kind: input, shape index: {}]   ;;  %s1399_s1 = inlined_call_operand.vmem [shape: bf16[64,64], index: 1, kind: input, shape index: {}]   ;;  %s1400_s2 = inlined_call_operand.vmem [shape: f32[1,64], index: 2, kind: input, shape index: {}]   ;;  %s1401_s3 = inlined_call_operand.vmem [shape: bf16[64,128], index: 3, kind: input, shape index: {}]   ;;  %s1402_s4 = inlined_call_operand.vmem [shape: f32[1,128], index: 4, kind: input, shape index: {}]   ;;  %s1403_s5 = inlined_call_operand.hbm [shape: f32[256,128], index: 5, kind: output, shape index: {}]  }
   0x1   :  { %12 = vsyncpa [#allocation3 + $0x1], 0  ;;  %s1092_s18 = smov 0   ;;  %s1094_s19 = smov 0  }
   0x2   :  { %s1096_s20 = smov 0   ;;  %s1098_s21 = smov 0  }
   0x3 LB: > { %s1113_s22 = sadd.s32 4294967295, %s1057_s21   ;;  %s803_s23 = sadd.s32 4294967294, %s1057_s21   ;;  %s1057_s21 = sphi %s1098_s21, %s1409_s21   ;;  %s1053_s20 = sphi %s1096_s20, %s1408_s20   ;;  %s1049_s19 = sphi %s1094_s19, %s1407_s19   ;;  %s1045_s18 = sphi %s1092_s18, %s1406_s18  }
   0x4   : > { %s1117_s24 = sadd.s32 1, %s1057_s21   ;;  %s135_s25 = sadd.s32 1, %s1053_s20 }
   0x5   : > { %s132_s26 = ssub.s32 %s1057_s21, %s1117_s24  ;;  %p145_p0 = scmp.ne.s32.totalorder %s1053_s20, %s1049_s19 }
   0x6   : > { %p133_p1 = scmp.eq.s32.totalorder %s132_s26, 0  ;;  %p146_p2 = scmp.eq.s32.totalorder %s1113_s22, 1 }
   0x7   : > { %p151_p3 = scmp.ne.s32.totalorder %s1049_s19, %s1045_s18  ;;  %p152_p4 = scmp.eq.s32.totalorder %s803_s23, 1 }
   0x8   : > { %s1128_s27 = scalar_select %p133_p1, %s1053_s20, %s135_s25  }
   0x9   : > { %p1130_p5 = por %p146_p2, %p145_p0  ;;  %p1134_p6 = por %p152_p4, %p151_p3 }
   0xa   : > { %p806_p7 = scmp.ge.s32.totalorder %s1057_s21, 1  ;;  %p191_p8 = scmp.lt.s32.totalorder %s1057_s21, 3 }
   0xc   : > { %p192_p9 = pnand %p806_p7, %p191_p8 }
   0xd   : > { %v955_v0 = vld [vmem:[%s1399_s1] sm:$0xff] (!%p192_p9)   ;;  %s808_s7 = sshll.u32 (!%p192_p9), %s1113_s22, 4  ;;  %v956_v1 = vld [vmem:[%s1399_s1 + $0x8] sm:$0xff] (!%p192_p9)   ;;  %v957_v2 = vld [vmem:[%s1399_s1 + $0x10] sm:$0xff] (!%p192_p9)   ;;  %vm290_vm0 = vcmask (!%p192_p9), 523264   ;;  %s841_s17 = sshll.u32 (!%p192_p9), %s1113_s22, 11 }
   0xe   : > { %195 = sbr.rel (%p192_p9) target bundleno = 531 (0x213), region = 40  ;;  %p220_p10 = scmp.lt.s32.totalorder (!%p192_p9), %s808_s7, 31  ;;  %866 = vmatprep.subr.bf16.mxu0 (!%p192_p9), %v955_v0  ;;  %v959_v3 = vld [vmem:[%s1401_s3] sm:$0xff] (!%p192_p9)   ;;  %v960_v4 = vld [vmem:[%s1401_s3 + $0x8] sm:$0xff] (!%p192_p9)   ;;  %v958_v7 = vld [vmem:[%s1399_s1 + $0x18] sm:$0xff] (!%p192_p9)  }
   0xf   : > { %867 = vmatpush3.bf16.msra.mxu0 (!%p192_p9), %v955_v0  ;;  %890 = vmatprep.subr.bf16.mxu1 (!%p192_p9), %v959_v3  ;;  %v961_v30 = vld [vmem:[%s1401_s3 + $0x10] sm:$0xff] (!%p192_p9)   ;;  %v962_v31 = vld [vmem:[%s1401_s3 + $0x18] sm:$0xff] (!%p192_p9)   ;;  %v810_v32 = vld [vmem:[%s1400_s2] ss:$0 sm:$0xff] (!%p192_p9)  ;;  %s1343_s30 = scalar_lea.hbm (!%p192_p9), %s1403_s5, %s841_s17 }
  0x10   : > { %868 = vmatprep.subr.bf16.mxu0 (!%p192_p9), %v956_v1  ;;  %891 = vmatpush3.bf16.msra.mxu1 (!%p192_p9), %v959_v3 }
  0x11   : > { %892 = vmatprep.subr.bf16.mxu1 (!%p192_p9), %v960_v4 }
  0x13   : > { %869 = vmatpush3.bf16.msra.mxu0 (!%p192_p9), %v956_v1 }
  0x14   : > { %870 = vmatprep.subr.bf16.mxu0 (!%p192_p9), %v957_v2  ;;  %893 = vmatpush3.bf16.msra.mxu1 (!%p192_p9), %v960_v4 }
  0x15   : > { %s1411_s7 = smov (!%p220_p10, %s808_s7), 31  ;;  %894 = vmatprep.subr.bf16.mxu1 %v961_v30 }
  0x16   : > { %s809_s14 = sshll.u32 %s1411_s7, 3  ;;  %s1059_s7 = smov [#allocation2]  }
  0x17   : > { %s1159_s25 = scalar_lea.vmem %s1398_s0, %s809_s14  ;;  %871 = vmatpush3.bf16.msra.mxu0 %v957_v2  ;;  %s216_s14 = sand.u32 1, %s1049_s19  }
  0x18   : > { %v227_v5 = vld [vmem:[%s1159_s25] sm:$0xff]  ;;  %v228_v6 = vld [vmem:[%s1159_s25 + $0x8] sm:$0xff]  ;;  %v229_v9 = vld [vmem:[%s1159_s25 + $0x10] sm:$0xff]  ;;  %872 = vmatprep.subr.bf16.mxu0 %v958_v7  ;;  %895 = vmatpush3.bf16.msra.mxu1 %v961_v30  ;;  %s807_s15 = sshll.u32 %s216_s14, 7  ;;  %s1357_s22 = scalar_lea.sflag [#allocation3], %s216_s14 }
  0x19   : > { %v243_v8 = vpack.c.bf16 %v228_v6, %v227_v5  ;;  %v230_v10 = vld [vmem:[%s1159_s25 + $0x18] sm:$0xff]  ;;  %v231_v11 = vld [vmem:[%s1159_s25 + $0x20] sm:$0xff]  ;;  %v232_v12 = vld [vmem:[%s1159_s25 + $0x28] sm:$0xff]  ;;  %896 = vmatprep.subr.bf16.mxu1 %v962_v31  ;;  %s1267_s16 = scalar_lea.vmem [#allocation2], %s807_s15  ;;  %s999_s8 = sshll.u32 %s1059_s7, 4  ;;  %s1000_s8 = int_to_ptr.vmem [resolvable:$false] %s999_s8 }
  0x1a   : > { %v244_v13 = vpack.c.bf16 %v230_v10, %v229_v9  ;;  %v245_v14 = vpack.c.bf16 %v232_v12, %v231_v11  ;;  %v233_v15 = vld [vmem:[%s1159_s25 + $0x30] sm:$0xff]  ;;  %v234_v16 = vld [vmem:[%s1159_s25 + $0x38] sm:$0xff]  ;;  %v235_v17 = vld [vmem:[%s1159_s25 + $0x40] sm:$0xff]  ;;  %s741_s23 = sshll.u32 %s1267_s16, 4  ;;  %s1001_s9 = scalar_lea.vmem %s1000_s8, 4096  ;;  %s1345_s23 = int_to_ptr.vmem [resolvable:$true] %s741_s23 }
  0x1b   : > { %874 = vmatprep.mubr.msk.bf16.mxu0 %vm290_vm0, %v243_v8  ;;  %873 = vmatpush3.bf16.msra.mxu0 %v958_v7  ;;  %v236_v18 = vld [vmem:[%s1159_s25 + $0x48] sm:$0xff]  ;;  %v246_v19 = vpack.c.bf16 %v234_v16, %v233_v15  ;;  %v237_v21 = vld [vmem:[%s1159_s25 + $0x50] sm:$0xff]  ;;  %v238_v22 = vld [vmem:[%s1159_s25 + $0x58] sm:$0xff]  ;;  %s995_s6 = scalar_lea.vmem %s1345_s23, 2048  ;;  %p1002_p0 = scmp.lt.s32.totalorder %s1345_s23, %s1000_s8 }
  0x1c   : > { %v247_v20 = vpack.c.bf16 %v236_v18, %v235_v17  ;;  %v239_v23 = vld [vmem:[%s1159_s25 + $0x60] sm:$0xff]  ;;  %v240_v24 = vld [vmem:[%s1159_s25 + $0x68] sm:$0xff]  ;;  %v248_v25 = vpack.c.bf16 %v238_v22, %v237_v21  ;;  %v241_v27 = vld [vmem:[%s1159_s25 + $0x70] sm:$0xff]  ;;  %897 = vmatpush3.bf16.msra.mxu1 %v962_v31  ;;  %p996_p11 = scmp.ne.s32.totalorder %s1345_s23, %s995_s6  ;;  %p1003_p1 = scmp.lt.s32.totalorder %s1001_s9, %s995_s6 }
  0x1d   : > { %v249_v26 = vpack.c.bf16 %v240_v24, %v239_v23  ;;  %v242_v28 = vld [vmem:[%s1159_s25 + $0x78] sm:$0xff] }
  0x1e   : > { %875 = vmatmul.mubr.msk.bf16.vlgmr.msra.gmra.mrb[0].mxu0 %vm290_vm0, %v244_v13  ;;  %v250_v29 = vpack.c.bf16 %v242_v28, %v241_v27  ;;  %p997_p12 = pnand %p996_p11, %p1130_p5  ;;  %p1004_p2 = por %p1003_p1, %p1002_p0 }
  0x1f   : > { %878 = vmatprep.mubr.msk.bf16.mxu0 %vm290_vm0, %v245_v14 }
  0x20   : > { %p998_p13 = pneg %p997_p12 }
  0x22   : > { %p1005_p3 = pnand %p1004_p2, %p998_p13 }
  0x26   : > { %879 = vmatmul.mubr.msk.bf16.gmra.mrb[4].mxu0 %vm290_vm0, %v246_v19 }
  0x27   : > { %882 = vmatprep.mubr.msk.bf16.mxu0 %vm290_vm0, %v247_v20 }
  0x2e   : > { %883 = vmatmul.mubr.msk.bf16.gmra.mrb[8].mxu0 %vm290_vm0, %v248_v25  ;;  %v1208_v25 = vld [vmem:[%s1402_s4] ss:$0 sm:$0xff] }
  0x2f   : > { %886 = vmatprep.mubr.msk.bf16.mxu0 %vm290_vm0, %v249_v26 }
  0x36   : > { %887 = vmatmul.mubr.msk.bf16.gmra.mrb[12].mxu0 %vm290_vm0, %v250_v29 }
  0xf1   : > { %v876_v33 = vpop.f32.mrb[0].mxu0 }
  0xf2   : > { %v358_v34 = vadd.f32 %v876_v33, %v810_v32  ;;  %v349_v35 = vpop.f32.mrb[1].mxu0 }
  0xf3   : > { %v350_v36 = vadd.f32 %v810_v32, %v349_v35  ;;  %v877_v37 = vpop.f32.mrb[2].mxu0 }
  0xf4   : > { %v361_v38 = vadd.f32 %v877_v37, %v810_v32  ;;  %v352_v39 = vpop.f32.mrb[3].mxu0  ;;  %v414_v41 = vmax.f32 %v358_v34, 0.0 }
  0xf5   : > { %v353_v40 = vadd.f32 %v810_v32, %v352_v39  ;;  %v412_v43 = vmax.f32 %v350_v36, 0.0 }
  0xf6   : > { %v415_v42 = vmax.f32 %v361_v38, 0.0 }
  0xf7   : > { %v413_v44 = vmax.f32 %v353_v40, 0.0 }
  0xf8   : > { %v429_v45 = vpack.c.bf16 %v415_v42, %v414_v41  ;;  %v692_v41 = vlaneseq }
  0xf9   : > { %v880_v46 = vpop.f32.mrb[4].mxu0  ;;  %v428_v47 = vpack.c.bf16 %v413_v44, %v412_v43 }
  0xfa   : > { %v374_v48 = vadd.f32 %v880_v46, %v810_v32  ;;  %v365_v49 = vpop.f32.mrb[5].mxu0 }
  0xfb   : > { %v366_v50 = vadd.f32 %v810_v32, %v365_v49  ;;  %v881_v51 = vpop.f32.mrb[6].mxu0  ;;  %898 = vmatprep.mubr.msk.bf16.mxu1 %vm290_vm0, %v428_v47 }
  0xfc   : > { %v377_v52 = vadd.f32 %v881_v51, %v810_v32  ;;  %v368_v53 = vpop.f32.mrb[7].mxu0  ;;  %899 = vmatmul.mubr.msk.bf16.vlgmr.msra.gmra.mrb[0].mxu1 %vm290_vm0, %v429_v45  ;;  %v418_v55 = vmax.f32 %v374_v48, 0.0 }
  0xfd   : > { %v369_v54 = vadd.f32 %v810_v32, %v368_v53  ;;  %v416_v57 = vmax.f32 %v366_v50, 0.0  ;;  %v1241_v50 = vand.u32 127, %v692_v41 }
  0xfe   : > { %v419_v56 = vmax.f32 %v377_v52, 0.0 }
  0xff   : > { %v417_v58 = vmax.f32 %v369_v54, 0.0  ;;  %vm694_vm1 = vcmp.ge.s32.totalorder %v1241_v50, 16 }
 0x100   : > { %v431_v59 = vpack.c.bf16 %v419_v56, %v418_v55 }
 0x101   : > { %v430_v60 = vpack.c.bf16 %v417_v58, %v416_v57  ;;  %v884_v61 = vpop.f32.mrb[8].mxu0 }
 0x102   : > { %v390_v62 = vadd.f32 %v884_v61, %v810_v32  ;;  %v381_v63 = vpop.f32.mrb[9].mxu0 }
 0x103   : > { %v382_v0 = vadd.f32 %v810_v32, %v381_v63  ;;  %v885_v1 = vpop.f32.mrb[10].mxu0  ;;  %902 = vmatprep.mubr.msk.bf16.mxu1 %vm290_vm0, %v430_v60 }
 0x104   : > { %v393_v2 = vadd.f32 %v885_v1, %v810_v32  ;;  %v384_v3 = vpop.f32.mrb[11].mxu0  ;;  %903 = vmatmul.mubr.msk.bf16.gmra.mrb[4].mxu1 %vm290_vm0, %v431_v59  ;;  %v422_v5 = vmax.f32 %v390_v62, 0.0 }
 0x105   : > { %v385_v4 = vadd.f32 %v810_v32, %v384_v3  ;;  %v420_v7 = vmax.f32 %v382_v0, 0.0 }
 0x106   : > { %v423_v6 = vmax.f32 %v393_v2, 0.0 }
 0x107   : > { %v421_v8 = vmax.f32 %v385_v4, 0.0 }
 0x108   : > { %v433_v9 = vpack.c.bf16 %v423_v6, %v422_v5 }
 0x109   : > { %v432_v10 = vpack.c.bf16 %v421_v8, %v420_v7  ;;  %v888_v11 = vpop.f32.mrb[12].mxu0 }
 0x10a   : > { %v406_v12 = vadd.f32 %v888_v11, %v810_v32  ;;  %v397_v13 = vpop.f32.mrb[13].mxu0 }
 0x10b   : > { %v398_v14 = vadd.f32 %v810_v32, %v397_v13  ;;  %v889_v15 = vpop.f32.mrb[14].mxu0  ;;  %906 = vmatprep.mubr.msk.bf16.mxu1 %vm290_vm0, %v432_v10 }
 0x10c   : > { %v409_v16 = vadd.f32 %v889_v15, %v810_v32  ;;  %v400_v17 = vpop.f32.mrb[15].mxu0  ;;  %907 = vmatmul.mubr.msk.bf16.gmra.mrb[8].mxu1 %vm290_vm0, %v433_v9  ;;  %v426_v19 = vmax.f32 %v406_v12, 0.0 }
 0x10d   : > { %v401_v18 = vadd.f32 %v810_v32, %v400_v17  ;;  %v424_v21 = vmax.f32 %v398_v14, 0.0 }
 0x10e   : > { %v427_v20 = vmax.f32 %v409_v16, 0.0 }
 0x10f   : > { %v425_v22 = vmax.f32 %v401_v18, 0.0 }
 0x110   : > { %v435_v23 = vpack.c.bf16 %v427_v20, %v426_v19 }
 0x111   : > { %v434_v24 = vpack.c.bf16 %v425_v22, %v424_v21 }
 0x113   : > { %910 = vmatprep.mubr.msk.bf16.mxu1 %vm290_vm0, %v434_v24 }
 0x114   : > { %911 = vmatmul.mubr.msk.bf16.gmra.mrb[12].mxu1 %vm290_vm0, %v435_v23 }
 0x1cf   : > { %v900_v26 = vpop.f32.mrb[0].mxu1 }
 0x1d0   : > { %v1211_v27 = vadd.f32 %v900_v26, %v1208_v25  ;;  %v533_v28 = vpop.f32.mrb[1].mxu1 }
 0x1d1   : > { %v1214_v29 = vadd.f32 %v1208_v25, %v533_v28  ;;  %v901_v30 = vpop.f32.mrb[2].mxu1 }
 0x1d2   : > { %v598_v31 = vmul.f32 0.5, %v1211_v27  ;;  %v1218_v32 = vadd.f32 %v901_v30, %v1208_v25  ;;  %v536_v33 = vpop.f32.mrb[3].mxu1 }
 0x1d3   : > { %v596_v34 = vmul.f32 0.5, %v1214_v29  ;;  %v1222_v35 = vadd.f32 %v1208_v25, %v536_v33 }
 0x1d4   : > { %963 = vtanh.f32 %v598_v31  ;;  %v599_v36 = vmul.f32 0.5, %v1218_v32 }
 0x1d5   : > { %965 = vtanh.f32 %v596_v34  ;;  %v597_v37 = vmul.f32 0.5, %v1222_v35 }
 0x1d6   : > { %967 = vtanh.f32 %v599_v36 }
 0x1d7   : > { %969 = vtanh.f32 %v597_v37  ;;  %v904_v38 = vpop.f32.mrb[4].mxu1 }
 0x1d8   : > { %v1227_v39 = vadd.f32 %v904_v38, %v1208_v25  ;;  %v549_v40 = vpop.f32.mrb[5].mxu1 }
 0x1d9   : > { %v1230_v42 = vadd.f32 %v1208_v25, %v549_v40  ;;  %v905_v43 = vpop.f32.mrb[6].mxu1 }
 0x1da   : > { %v602_v44 = vmul.f32 0.5, %v1227_v39  ;;  %v1234_v45 = vadd.f32 %v905_v43, %v1208_v25  ;;  %v552_v46 = vpop.f32.mrb[7].mxu1 }
 0x1db   : > { %v600_v47 = vmul.f32 0.5, %v1230_v42  ;;  %v1238_v48 = vadd.f32 %v1208_v25, %v552_v46 }
 0x1dc   : > { %971 = vtanh.f32 %v602_v44  ;;  %v603_v49 = vmul.f32 0.5, %v1234_v45 }
 0x1dd   : > { %973 = vtanh.f32 %v600_v47  ;;  %v601_v51 = vmul.f32 0.5, %v1238_v48 }
 0x1de   : > { %v964_v52 = vpop.eup %963  ;;  %975 = vtanh.f32 %v603_v49 }
 0x1df   : > { %v966_v53 = vpop.eup %965  ;;  %v630_v54 = vadd.f32 1.0, %v964_v52  ;;  %977 = vtanh.f32 %v601_v51  ;;  %v908_v55 = vpop.f32.mrb[8].mxu1 }
 0x1e0   : > { %v968_v56 = vpop.eup %967  ;;  %v628_v57 = vadd.f32 1.0, %v966_v53  ;;  %v1246_v58 = vadd.f32 %v908_v55, %v1208_v25  ;;  %v565_v59 = vpop.f32.mrb[9].mxu1 }
 0x1e1   : > { %v970_v60 = vpop.eup %969  ;;  %v646_v61 = vmul.f32 0.5, %v630_v54  ;;  %v631_v62 = vadd.f32 1.0, %v968_v56  ;;  %v1250_v63 = vadd.f32 %v1208_v25, %v565_v59  ;;  %v909_v0 = vpop.f32.mrb[10].mxu1 }
 0x1e2   : > { %v644_v1 = vmul.f32 0.5, %v628_v57  ;;  %v629_v2 = vadd.f32 1.0, %v970_v60  ;;  %v606_v3 = vmul.f32 0.5, %v1246_v58  ;;  %v1256_v4 = vadd.f32 %v909_v0, %v1208_v25  ;;  %v568_v5 = vpop.f32.mrb[11].mxu1 }
 0x1e3   : > { %v662_v6 = vmul.f32 0.9, %v646_v61  ;;  %v647_v7 = vmul.f32 0.5, %v631_v62  ;;  %v604_v8 = vmul.f32 0.5, %v1250_v63  ;;  %v1260_v9 = vadd.f32 %v1208_v25, %v568_v5 }
 0x1e4   : > { %v660_v10 = vmul.f32 0.9, %v644_v1  ;;  %v645_v11 = vmul.f32 0.5, %v629_v2  ;;  %979 = vtanh.f32 %v606_v3  ;;  %v607_v12 = vmul.f32 0.5, %v1256_v4 }
 0x1e5   : > { %v678_v13 = vadd.f32 0.1, %v662_v6  ;;  %v663_v14 = vmul.f32 0.9, %v647_v7  ;;  %981 = vtanh.f32 %v604_v8  ;;  %v605_v15 = vmul.f32 0.5, %v1260_v9 }
 0x1e6   : > { %v972_v16 = vpop.eup %971  ;;  %v676_v17 = vadd.f32 0.1, %v660_v10  ;;  %v661_v18 = vmul.f32 0.9, %v645_v11  ;;  %983 = vtanh.f32 %v607_v12 }
 0x1e7   : > { %v974_v19 = vpop.eup %973  ;;  %v697_v20 = vsel %vm694_vm1, %v678_v13, %v1211_v27  ;;  %v679_v21 = vadd.f32 0.1, %v663_v14  ;;  %v634_v22 = vadd.f32 1.0, %v972_v16  ;;  %985 = vtanh.f32 %v605_v15  ;;  %v912_v23 = vpop.f32.mrb[12].mxu1 }
 0x1e8   : > { %v976_v24 = vpop.eup %975  ;;  %713 = vst [vmem:[%s1267_s16 + $0x10] sm:$0xff] %v697_v20  ;;  %v695_v26 = vsel %vm694_vm1, %v676_v17, %v1214_v29  ;;  %v677_v28 = vadd.f32 0.1, %v661_v18  ;;  %v632_v30 = vadd.f32 1.0, %v974_v19  ;;  %v1274_v27 = vadd.f32 %v912_v23, %v1208_v25  ;;  %v581_v31 = vpop.f32.mrb[13].mxu1 }
 0x1e9   : > { %v978_v33 = vpop.eup %977  ;;  %711 = vst [vmem:[%s1267_s16] sm:$0xff] %v695_v26  ;;  %v698_v34 = vsel %vm694_vm1, %v679_v21, %v1218_v32  ;;  %v650_v36 = vmul.f32 0.5, %v634_v22  ;;  %v635_v37 = vadd.f32 1.0, %v976_v24  ;;  %v1281_v38 = vadd.f32 %v1208_v25, %v581_v31  ;;  %v913_v40 = vpop.f32.mrb[14].mxu1 }
 0x1ea   : > { %714 = vst [vmem:[%s1267_s16 + $0x18] sm:$0xff] %v698_v34  ;;  %v696_v29 = vsel %vm694_vm1, %v677_v28, %v1222_v35  ;;  %v648_v41 = vmul.f32 0.5, %v632_v30  ;;  %v633_v43 = vadd.f32 1.0, %v978_v33  ;;  %v610_v44 = vmul.f32 0.5, %v1274_v27  ;;  %v584_v46 = vpop.f32.mrb[15].mxu1 }
 0x1eb   : > { %712 = vst [vmem:[%s1267_s16 + $0x8] sm:$0xff] %v696_v29  ;;  %v666_v47 = vmul.f32 0.9, %v650_v36  ;;  %v651_v49 = vmul.f32 0.5, %v635_v37  ;;  %v608_v32 = vmul.f32 0.5, %v1281_v38  ;;  %v1291_v51 = vadd.f32 %v913_v40, %v1208_v25 }
 0x1ec   : > { %v664_v52 = vmul.f32 0.9, %v648_v41  ;;  %v649_v53 = vmul.f32 0.5, %v633_v43  ;;  %987 = vtanh.f32 %v610_v44  ;;  %v1294_v54 = vadd.f32 %v1208_v25, %v584_v46 }
 0x1ed   : > { %v682_v35 = vadd.f32 0.1, %v666_v47  ;;  %v667_v55 = vmul.f32 0.9, %v651_v49  ;;  %989 = vtanh.f32 %v608_v32  ;;  %v611_v56 = vmul.f32 0.5, %v1291_v51 }
 0x1ee   : > { %v980_v57 = vpop.eup %979  ;;  %v680_v59 = vadd.f32 0.1, %v664_v52  ;;  %v665_v60 = vmul.f32 0.9, %v649_v53  ;;  %v609_v61 = vmul.f32 0.5, %v1294_v54 }
 0x1ef   : > { %v982_v62 = vpop.eup %981  ;;  %v701_v0 = vsel %vm694_vm1, %v682_v35, %v1227_v39  ;;  %v683_v1 = vadd.f32 0.1, %v667_v55  ;;  %v638_v25 = vadd.f32 1.0, %v980_v57  ;;  %991 = vtanh.f32 %v611_v56 }
 0x1f0   : > { %v984_v2 = vpop.eup %983  ;;  %717 = vst [vmem:[%s1267_s16 + $0x30] sm:$0xff] %v701_v0  ;;  %v699_v3 = vsel %vm694_vm1, %v680_v59, %v1230_v42  ;;  %v681_v5 = vadd.f32 0.1, %v665_v60  ;;  %v636_v6 = vadd.f32 1.0, %v982_v62  ;;  %993 = vtanh.f32 %v609_v61 }
 0x1f1   : > { %v986_v7 = vpop.eup %985  ;;  %715 = vst [vmem:[%s1267_s16 + $0x20] sm:$0xff] %v699_v3  ;;  %v702_v8 = vsel %vm694_vm1, %v683_v1, %v1234_v45  ;;  %v654_v39 = vmul.f32 0.5, %v638_v25  ;;  %v639_v10 = vadd.f32 1.0, %v984_v2 }
 0x1f2   : > { %718 = vst [vmem:[%s1267_s16 + $0x38] sm:$0xff] %v702_v8  ;;  %v700_v11 = vsel %vm694_vm1, %v681_v5, %v1238_v48  ;;  %v652_v12 = vmul.f32 0.5, %v636_v6  ;;  %v637_v13 = vadd.f32 1.0, %v986_v7 }
 0x1f3   : > { %716 = vst [vmem:[%s1267_s16 + $0x28] sm:$0xff] %v700_v11  ;;  %v670_v42 = vmul.f32 0.9, %v654_v39  ;;  %v655_v14 = vmul.f32 0.5, %v639_v10 }
 0x1f4   : > { %v668_v15 = vmul.f32 0.9, %v652_v12  ;;  %v653_v16 = vmul.f32 0.5, %v637_v13 }
 0x1f5   : > { %v686_v17 = vadd.f32 0.1, %v670_v42  ;;  %v671_v18 = vmul.f32 0.9, %v655_v14 }
 0x1f6   : > { %v988_v19 = vpop.eup %987  ;;  %v684_v45 = vadd.f32 0.1, %v668_v15  ;;  %v669_v20 = vmul.f32 0.9, %v653_v16 }
 0x1f7   : > { %v990_v21 = vpop.eup %989  ;;  %v705_v48 = vsel %vm694_vm1, %v686_v17, %v1246_v58  ;;  %v687_v22 = vadd.f32 0.1, %v671_v18  ;;  %v642_v23 = vadd.f32 1.0, %v988_v19 }
 0x1f8   : > { %721 = vst [vmem:[%s1267_s16 + $0x50] sm:$0xff] %v705_v48  ;;  %v703_v24 = vsel %vm694_vm1, %v684_v45, %v1250_v63  ;;  %v685_v26 = vadd.f32 0.1, %v669_v20  ;;  %v640_v28 = vadd.f32 1.0, %v990_v21 }
 0x1f9   : > { %v992_v30 = vpop.eup %991  ;;  %719 = vst [vmem:[%s1267_s16 + $0x40] sm:$0xff] %v703_v24  ;;  %v706_v31 = vsel %vm694_vm1, %v687_v22, %v1256_v4  ;;  %v658_v33 = vmul.f32 0.5, %v642_v23 }
 0x1fa   : > { %v994_v58 = vpop.eup %993  ;;  %722 = vst [vmem:[%s1267_s16 + $0x58] sm:$0xff] %v706_v31  ;;  %v704_v34 = vsel %vm694_vm1, %v685_v26, %v1260_v9  ;;  %v656_v36 = vmul.f32 0.5, %v640_v28  ;;  %v643_v63 = vadd.f32 1.0, %v992_v30 }
 0x1fb   : > { %720 = vst [vmem:[%s1267_s16 + $0x48] sm:$0xff] %v704_v34  ;;  %v674_v37 = vmul.f32 0.9, %v658_v33  ;;  %v641_v40 = vadd.f32 1.0, %v994_v58 }
 0x1fc   : > { %v672_v29 = vmul.f32 0.9, %v656_v36  ;;  %v659_v41 = vmul.f32 0.5, %v643_v63 }
 0x1fd   : > { %v690_v43 = vadd.f32 0.1, %v674_v37  ;;  %v657_v4 = vmul.f32 0.5, %v641_v40 }
 0x1fe   : > { %v688_v44 = vadd.f32 0.1, %v672_v29  ;;  %v675_v46 = vmul.f32 0.9, %v659_v41 }
 0x1ff   : > { %v709_v9 = vsel %vm694_vm1, %v690_v43, %v1274_v27  ;;  %v673_v47 = vmul.f32 0.9, %v657_v4 }
 0x200   : > { %725 = vst [vmem:[%s1267_s16 + $0x70] sm:$0xff] %v709_v9  ;;  %v707_v49 = vsel %vm694_vm1, %v688_v44, %v1281_v38  ;;  %v691_v32 = vadd.f32 0.1, %v675_v46 }
 0x201   : > { %723 = vst [vmem:[%s1267_s16 + $0x60] sm:$0xff] %v707_v49  ;;  %v689_v52 = vadd.f32 0.1, %v673_v47 }
 0x202   : > { %v710_v27 = vsel %vm694_vm1, %v691_v32, %v1291_v51 }
 0x203   : > { %726 = vst [vmem:[%s1267_s16 + $0x78] sm:$0xff] %v710_v27  ;;  %v708_v38 = vsel %vm694_vm1, %v689_v52, %v1294_v54 }
 0x204   : > { %724 = vst [vmem:[%s1267_s16 + $0x68] sm:$0xff] %v708_v38 }
 0x205   : > { %1008 = shalt.err (!%p1005_p3)
}
 0x206   : > { %s1009_s10 = scalar_lea.hbm %s1343_s30, 2048  ;;  %s1013_s13 = scalar_lea.hbm %s1403_s5, 4096 }
 0x207   : > { %p1010_p4 = scmp.ne.s32.totalorder %s1343_s30, %s1009_s10  ;;  %p1014_p9 = scmp.lt.u32.totalorder %s1343_s30, %s1403_s5 }
 0x208   : > { %p1015_p10 = scmp.lt.u32.totalorder %s1013_s13, %s1009_s10  ;;  %p1017_p12 = scmp.lt.u32.totalorder %s1009_s10, %s1343_s30 }
 0x209   : > { %p1011_p7 = pnand %p1010_p4, %p1130_p5 }
 0x20a   : > { %p1016_p11 = por %p1015_p10, %p1014_p9 }
 0x20b   : > { %p1012_p8 = pneg %p1011_p7 }
 0x20c   : > { %p1018_p13 = por %p1017_p12, %p1016_p11 }
 0x20e   : > { %p1019_p0 = pnand %p1018_p13, %p1012_p8 }
 0x210   : > { %1022 = shalt.err (!%p1019_p0)
}
 0x211   : > { %s1060_s16 = smov 128   ;;  %s1061_s17 = smov 8  }
 0x212   : > { %914 = dma.vmem_to_hbm [thread:$0]  (%p1130_p5), %s1345_s23, 2048, %s1343_s30, %s1357_s22, %s1060_s16, %s1060_s16, %s1061_s17  }
 0x213 PF: > { %p920_p1 = scmp.ge.s32.totalorder %s1057_s21, 2  ;;  %s756_s25 = sand.u32 1, %s1045_s18  }
 0x214   : > { %s757_s26 = scalar_lea.sflag [#allocation3], %s756_s25 }
 0x215   : > { %p917_p2 = pnand %p920_p1, %p1134_p6 }
 0x217   : > { %1040 = dma.done.wait (!%p917_p2), %s757_s26, 2048  }
 0x218   : > { %1042 = vsyncadd (!%p917_p2), %s757_s26, 4294965248  ;;  %p15_p3 = scmp.ge.s32.totalorder %s1117_s24, 4   ;;  %s1406_s18 = smov %s1049_s19 }
 0x219   : > { %s1407_s19 = smov %s1053_s20  ;;  %s1408_s20 = smov %s1128_s27 }
 0x21a   : > { %s1409_s21 = smov %s1117_s24  ;;  %17 = sbr.rel (!%p15_p3) target bundleno = 3 (0x3), region = 75 }
 0x221   :  { %762 = vsyncpa [#allocation3], 1 }
 0x222   :  { %764 = vsyncpa [#allocation3 + $0x1], 1 }

</bundles_post_ra>
